<compile_context>
chip_gen: v5e
topology: v5e:2x2
jax: 0.10.0
libtpu: 0.0.40
codegen_flags: <defaults>
</compile_context>

<pallas_src>
import functools

import jax
import jax.numpy as jnp
from jax.experimental import pallas as pl
from jax.experimental.pallas import tpu as pltpu


def _dice_kernel(x_ref, t_ref, o_ref, *, squared, num_channels, block_rows,
                 rows_valid, num_blocks, blocks_per_split, needs_mask,
                 uneven_split):
    # x_ref: (C, R, L) logits block    t_ref: (R, L) target block
    # o_ref: (3, 8, L) per-(batch, split) accumulators [sum(p1*t), sum(p1), sum(t)]
    sp = pl.program_id(1)                      # parallel spatial split
    s = pl.program_id(2)                       # sequential block within split
    g = sp * blocks_per_split + s              # global spatial block index

    @pl.when(s == 0)
    def _():
        o_ref[...] = jnp.zeros_like(o_ref)

    def _accum(row, val):
        # Reduce (R, L) -> at most (8, L) with vreg-wise adds, accumulate.
        r, lanes = val.shape
        r8 = (r // 8) * 8
        if r8:
            o_ref[row] += val[:r8].reshape(r8 // 8, 8, lanes).sum(axis=0)
        if r != r8:
            o_ref[row, 0:r - r8, :] += val[r8:]

    def _accumulate(p1, t):
        inter = p1 * t                         # numerator uses un-squared
        if squared:
            p1 = p1 * p1
            t = t * t
        _accum(0, inter)
        _accum(1, p1)
        _accum(2, t)

    def _probs_and_target():
        t = t_ref[...].astype(jnp.float32)     # (R, L)
        if num_channels == 2:
            # Binary case: softmax channel 1 of 2 == sigmoid(x1 - x0).
            # One exp + one EUP reciprocal per position; clip keeps exp finite
            # (|z| > 30 is already numerically saturated).
            x0 = x_ref[0].astype(jnp.float32)
            x1 = x_ref[1].astype(jnp.float32)
            z = jnp.clip(x1 - x0, -30.0, 30.0)
            d = 1.0 + jnp.exp(-z)
            inv = pl.reciprocal(d, approx=True)
            p1 = inv * (2.0 - d * inv)         # one Newton step -> f32 exact
        else:
            # General softmax over channels, streamed channel-by-channel so no
            # (C, R, L) f32 temporary is ever materialized.  Channels live on
            # the leading block dim -> all combines are elementwise VPU ops.
            m = x_ref[0].astype(jnp.float32)
            for c in range(1, num_channels):
                m = jnp.maximum(m, x_ref[c].astype(jnp.float32))
            denom = None
            e1 = None
            for c in range(num_channels):
                ec = jnp.exp(x_ref[c].astype(jnp.float32) - m)
                denom = ec if denom is None else denom + ec
                if c == 1:
                    e1 = ec
            inv = pl.reciprocal(denom, approx=True)
            inv = inv * (2.0 - denom * inv)    # Newton step -> f32 exact
            p1 = e1 * inv
        return p1, t

    def _step():
        p1, t = _probs_and_target()
        if needs_mask:
            # Only the last real spatial block can contain garbage rows
            # (partial edge block); predicate the mask so the iota/compare/
            # select work runs on that single step only.
            is_last = g == (num_blocks - 1)

            @pl.when(is_last)
            def _():
                rows = (jax.lax.broadcasted_iota(jnp.int32, p1.shape, 0)
                        + (num_blocks - 1) * block_rows)
                valid = rows < rows_valid
                _accumulate(jnp.where(valid, p1, 0.0),
                            jnp.where(valid, t, 0.0))

            @pl.when(g != num_blocks - 1)
            def _():
                _accumulate(p1, t)
        else:
            _accumulate(p1, t)

    if uneven_split:
        # With a 2-way spatial split the last split may own fewer blocks; its
        # trailing steps re-fetch a clamped (valid) block and are skipped here.
        pl.when(g < num_blocks)(_step)
    else:
        _step()


def _scoped_vmem_budget():
    # Stay under every generation's *default* scoped-VMEM limit (16 MiB v5e,
    # 32 MiB v6e/v7x) so no vmem_limit_bytes override is required.
    budget = 12 * 1024 * 1024
    try:
        kind = jax.devices()[0].device_kind.lower()
        if ("v6" in kind) or ("v7" in kind):
            budget = 24 * 1024 * 1024
    except Exception:
        pass
    return budget


def _pick_block_rows(rows_total, num_channels, lanes, x_itemsize, t_itemsize,
                     requested, budget):
    # Per-step VMEM: double-buffered logits + target blocks plus ~6 f32
    # temporaries the size of one (rows, lanes) tile.
    per_row = (2 * (num_channels * x_itemsize + t_itemsize) + 6 * 4) * lanes
    cap = max(8, budget // per_row)
    br = min(max(int(requested), 8), cap)
    if rows_total <= br:
        return rows_total                       # full extent (any size allowed)
    if br >= 32:
        return (br // 32) * 32                  # safe for bf16/int8 tiling too
    return max(8, (br // 8) * 8)


def dice_loss_raw(logits, target, squared=False, eps=1e-8, block_rows=2048):
    """Pallas equivalent of DiceLossRaw()(logits, target).

    logits: (N, C, H, W) with C >= 2 (binary dice uses channel 1).
    target: (N, H, W) 0/1 mask (any float/int dtype).  Returns scalar f32 loss.
    """
    N, C, H, W = logits.shape
    assert C >= 2, "binary dice loss needs at least 2 channels"
    HW = H * W

    if HW % 128 == 0:
        # Fast path: fully lane-dense layout via free reshapes (no transpose,
        # no pad, native dtypes straight from HBM).
        lanes = 128
        rows_total = HW // 128
        x = logits.reshape(N, C, rows_total, lanes)
        t = target.reshape(N, rows_total, lanes)
    else:
        # Ragged spatial size: block over H with W as the full-extent lane dim.
        # No wrapper-side pad/copy of the logits; the gated in-kernel row mask
        # handles the partial last H-block.
        lanes = W
        rows_total = H
        x = logits
        t = target

    budget = _scoped_vmem_budget()
    br = _pick_block_rows(rows_total, C, lanes,
                          logits.dtype.itemsize, target.dtype.itemsize,
                          requested=block_rows, budget=budget)
    num_blocks = -(-rows_total // br)
    needs_mask = (rows_total % br) != 0

    # v7x has 2 TensorCores: for N == 1 add a 2-way parallel spatial split so
    # the second core isn't idle (harmless elsewhere: just one extra partial).
    nsplit = 2 if (N == 1 and num_blocks >= 2) else 1
    blocks_per_split = -(-num_blocks // nsplit)
    uneven_split = nsplit * blocks_per_split != num_blocks

    kernel = functools.partial(
        _dice_kernel, squared=squared, num_channels=C, block_rows=br,
        rows_valid=rows_total, num_blocks=num_blocks,
        blocks_per_split=blocks_per_split, needs_mask=needs_mask,
        uneven_split=uneven_split)

    def _gblock(sp, s):
        g = sp * blocks_per_split + s
        if uneven_split:
            g = jnp.minimum(g, num_blocks - 1)   # keep DMA in-bounds
        return g

    partials = pl.pallas_call(
        kernel,
        out_shape=jax.ShapeDtypeStruct((N, nsplit, 3, 8, lanes), jnp.float32),
        grid_spec=pltpu.PrefetchScalarGridSpec(
            num_scalar_prefetch=0,
            grid=(N, nsplit, blocks_per_split),
            in_specs=[
                pl.BlockSpec((pl.Squeezed(), C, br, lanes),
                             lambda n, sp, s: (n, 0, _gblock(sp, s), 0)),
                pl.BlockSpec((pl.Squeezed(), br, lanes),
                             lambda n, sp, s: (n, _gblock(sp, s), 0)),
            ],
            out_specs=pl.BlockSpec(
                (pl.Squeezed(), pl.Squeezed(), 3, 8, lanes),
                lambda n, sp, s: (n, sp, 0, 0, 0)),
        ),
        compiler_params=pltpu.CompilerParams(
            # Batch + split axes shard across TensorCores; the spatial-block
            # axis is the sequential accumulation axis.
            dimension_semantics=("parallel", "parallel", "arbitrary"),
        ),
    )(x, t)

    sums = jnp.sum(partials, axis=(0, 1, 3, 4))   # (3,) = [inter, p1, target]
    numerator = 2.0 * sums[0] + eps
    denominator = sums[1] + sums[2] + eps
    return 1.0 - numerator / denominator


def _reference(logits, target, squared=False, eps=1e-8):
    probs = jax.nn.softmax(logits.astype(jnp.float32), axis=1)
    p1 = probs[:, 1]
    tgt = target.astype(jnp.float32)
    numerator = 2.0 * jnp.sum(p1 * tgt)
    if squared:
        p1 = p1 ** 2
        tgt = tgt ** 2
    denominator = jnp.sum(p1) + jnp.sum(tgt)
    return 1.0 - (numerator + eps) / (denominator + eps)


if __name__ == "__main__":
    key = jax.random.PRNGKey(0)
    k1, k2, k3, k4, k5, k6 = jax.random.split(key, 6)

    # 1) Standard case: H*W multiple of 128, C > 2 general softmax, N > 1.
    N, C, H, W = 2, 4, 16, 16
    logits = jax.random.normal(k1, (N, C, H, W), dtype=jnp.float32)
    target = (jax.random.uniform(k2, (N, H, W)) > 0.5).astype(jnp.float32)

    loss = jax.block_until_ready(dice_loss_raw(logits, target))
    ref = _reference(logits, target)
    assert jnp.allclose(loss, ref, rtol=1e-4, atol=1e-4), (loss, ref)

    loss_sq = jax.block_until_ready(dice_loss_raw(logits, target, squared=True))
    ref_sq = _reference(logits, target, squared=True)
    assert jnp.allclose(loss_sq, ref_sq, rtol=1e-4, atol=1e-4), (loss_sq, ref_sq)

    # 2) Ragged case: H*W not a multiple of 128 (H-blocked path, no padding).
    logits2 = jax.random.normal(k3, (1, 3, 10, 10), dtype=jnp.float32)
    target2 = (jax.random.uniform(k4, (1, 10, 10)) > 0.5).astype(jnp.float32)
    loss2 = jax.block_until_ready(dice_loss_raw(logits2, target2))
    ref2 = _reference(logits2, target2)
    assert jnp.allclose(loss2, ref2, rtol=1e-4, atol=1e-4), (loss2, ref2)

    # 3) N == 1, bf16 inputs, C == 2 sigmoid path, forced small block to
    #    exercise the 2-way spatial split, uneven split tail and gated mask.
    logits3 = jax.random.normal(k5, (1, 2, 96, 96)).astype(jnp.bfloat16)
    target3 = (jax.random.uniform(k6, (1, 96, 96)) > 0.5).astype(jnp.bfloat16)
    loss3 = jax.block_until_ready(dice_loss_raw(logits3, target3, block_rows=32))
    ref3 = _reference(logits3, target3)
    assert jnp.allclose(loss3, ref3, rtol=2e-3, atol=2e-3), (loss3, ref3)

    print("KERNEL_OK")
</pallas_src>

<mosaic_0001>
module attributes {stable_mosaic.version = 11 : i64} {
  func.func @_dice_kernel(%arg0: i32, %arg1: i32, %arg2: i32, %arg3: memref<1x4x2x128xf32, #tpu.memory_space<vmem>>, %arg4: memref<1x2x128xf32, #tpu.memory_space<vmem>>, %arg5: memref<1x1x3x8x128xf32, #tpu.memory_space<vmem>>) attributes {dimension_semantics = [#tpu.dimension_semantics<parallel>, #tpu.dimension_semantics<parallel>, #tpu.dimension_semantics<arbitrary>], iteration_bounds = array<i64: 2, 1, 1>, scalar_prefetch = 0 : i64, scratch_operands = 0 : i64, tpu.core_type = #tpu.core_type<tc>, window_params = [{transform_indices = @transform_0, window_bounds = array<i64: 1, 4, 2, 128>}, {transform_indices = @transform_1, window_bounds = array<i64: 1, 2, 128>}, {transform_indices = @transform_2, window_bounds = array<i64: 1, 1, 3, 8, 128>}]} {
    %c0_i32 = arith.constant 0 : i32
    %0 = arith.cmpi eq, %arg2, %c0_i32 : i32
    %1 = arith.extui %0 : i1 to i32
    %c0_i32_0 = arith.constant 0 : i32
    %2 = arith.cmpi ne, %1, %c0_i32_0 : i32
    scf.if %2 {
      %cst_62 = arith.constant 0.000000e+00 : f32
      %60 = vector.broadcast %cst_62 : f32 to vector<3x8x128xf32>
      %c0_63 = arith.constant 0 : index
      %c0_64 = arith.constant 0 : index
      %c0_65 = arith.constant 0 : index
      %c0_66 = arith.constant 0 : index
      %c0_67 = arith.constant 0 : index
      %61 = vector.load %arg5[%c0_63, %c0_64, %c0_65, %c0_66, %c0_67] : memref<1x1x3x8x128xf32, #tpu.memory_space<vmem>>, vector<1x1x3x8x128xf32>
      %62 = vector.shape_cast %61 : vector<1x1x3x8x128xf32> to vector<3x8x128xf32>
      %63 = vector.shape_cast %60 : vector<3x8x128xf32> to vector<1x1x3x8x128xf32>
      tpu.vector_store %arg5[%c0_63, %c0_64, %c0_65, %c0_66, %c0_67], %63 {strides = array<i32>} : memref<1x1x3x8x128xf32, #tpu.memory_space<vmem>>, vector<1x1x3x8x128xf32>,
    } else {
    }
    %c0 = arith.constant 0 : index
    %c0_1 = arith.constant 0 : index
    %c0_2 = arith.constant 0 : index
    %3 = vector.load %arg4[%c0, %c0_1, %c0_2] : memref<1x2x128xf32, #tpu.memory_space<vmem>>, vector<1x2x128xf32>
    %4 = vector.shape_cast %3 : vector<1x2x128xf32> to vector<2x128xf32>
    %c0_3 = arith.constant 0 : index
    %c0_4 = arith.constant 0 : index
    %c0_5 = arith.constant 0 : index
    %c0_6 = arith.constant 0 : index
    %5 = vector.load %arg3[%c0_3, %c0_4, %c0_5, %c0_6] : memref<1x4x2x128xf32, #tpu.memory_space<vmem>>, vector<1x1x2x128xf32>
    %6 = vector.shape_cast %5 : vector<1x1x2x128xf32> to vector<2x128xf32>
    %c0_7 = arith.constant 0 : index
    %c1 = arith.constant 1 : index
    %c0_8 = arith.constant 0 : index
    %c0_9 = arith.constant 0 : index
    %7 = vector.load %arg3[%c0_7, %c1, %c0_8, %c0_9] : memref<1x4x2x128xf32, #tpu.memory_space<vmem>>, vector<1x1x2x128xf32>
    %8 = vector.shape_cast %7 : vector<1x1x2x128xf32> to vector<2x128xf32>
    %9 = arith.maximumf %6, %8 : vector<2x128xf32>
    %c0_10 = arith.constant 0 : index
    %c2 = arith.constant 2 : index
    %c0_11 = arith.constant 0 : index
    %c0_12 = arith.constant 0 : index
    %10 = vector.load %arg3[%c0_10, %c2, %c0_11, %c0_12] : memref<1x4x2x128xf32, #tpu.memory_space<vmem>>, vector<1x1x2x128xf32>
    %11 = vector.shape_cast %10 : vector<1x1x2x128xf32> to vector<2x128xf32>
    %12 = arith.maximumf %9, %11 : vector<2x128xf32>
    %c0_13 = arith.constant 0 : index
    %c3 = arith.constant 3 : index
    %c0_14 = arith.constant 0 : index
    %c0_15 = arith.constant 0 : index
    %13 = vector.load %arg3[%c0_13, %c3, %c0_14, %c0_15] : memref<1x4x2x128xf32, #tpu.memory_space<vmem>>, vector<1x1x2x128xf32>
    %14 = vector.shape_cast %13 : vector<1x1x2x128xf32> to vector<2x128xf32>
    %15 = arith.maximumf %12, %14 : vector<2x128xf32>
    %c0_16 = arith.constant 0 : index
    %c0_17 = arith.constant 0 : index
    %c0_18 = arith.constant 0 : index
    %c0_19 = arith.constant 0 : index
    %16 = vector.load %arg3[%c0_16, %c0_17, %c0_18, %c0_19] : memref<1x4x2x128xf32, #tpu.memory_space<vmem>>, vector<1x1x2x128xf32>
    %17 = vector.shape_cast %16 : vector<1x1x2x128xf32> to vector<2x128xf32>
    %18 = arith.subf %17, %15 : vector<2x128xf32>
    %19 = math.exp %18 : vector<2x128xf32>
    %c0_20 = arith.constant 0 : index
    %c1_21 = arith.constant 1 : index
    %c0_22 = arith.constant 0 : index
    %c0_23 = arith.constant 0 : index
    %20 = vector.load %arg3[%c0_20, %c1_21, %c0_22, %c0_23] : memref<1x4x2x128xf32, #tpu.memory_space<vmem>>, vector<1x1x2x128xf32>
    %21 = vector.shape_cast %20 : vector<1x1x2x128xf32> to vector<2x128xf32>
    %22 = arith.subf %21, %15 : vector<2x128xf32>
    %23 = math.exp %22 : vector<2x128xf32>
    %24 = arith.addf %19, %23 : vector<2x128xf32>
    %c0_24 = arith.constant 0 : index
    %c2_25 = arith.constant 2 : index
    %c0_26 = arith.constant 0 : index
    %c0_27 = arith.constant 0 : index
    %25 = vector.load %arg3[%c0_24, %c2_25, %c0_26, %c0_27] : memref<1x4x2x128xf32, #tpu.memory_space<vmem>>, vector<1x1x2x128xf32>
    %26 = vector.shape_cast %25 : vector<1x1x2x128xf32> to vector<2x128xf32>
    %27 = arith.subf %26, %15 : vector<2x128xf32>
    %28 = math.exp %27 : vector<2x128xf32>
    %29 = arith.addf %24, %28 : vector<2x128xf32>
    %c0_28 = arith.constant 0 : index
    %c3_29 = arith.constant 3 : index
    %c0_30 = arith.constant 0 : index
    %c0_31 = arith.constant 0 : index
    %30 = vector.load %arg3[%c0_28, %c3_29, %c0_30, %c0_31] : memref<1x4x2x128xf32, #tpu.memory_space<vmem>>, vector<1x1x2x128xf32>
    %31 = vector.shape_cast %30 : vector<1x1x2x128xf32> to vector<2x128xf32>
    %32 = arith.subf %31, %15 : vector<2x128xf32>
    %33 = math.exp %32 : vector<2x128xf32>
    %34 = arith.addf %29, %33 : vector<2x128xf32>
    %35 = tpu.reciprocal %34 {approx = true} : vector<2x128xf32> -> vector<2x128xf32>
    %36 = arith.mulf %34, %35 : vector<2x128xf32>
    %cst = arith.constant 2.000000e+00 : f32
    %37 = vector.broadcast %cst : f32 to vector<2x128xf32>
    %38 = arith.subf %37, %36 : vector<2x128xf32>
    %39 = arith.mulf %35, %38 : vector<2x128xf32>
    %40 = arith.mulf %23, %39 : vector<2x128xf32>
    %41 = arith.mulf %40, %4 : vector<2x128xf32>
    %c0_32 = arith.constant 0 : index
    %c0_33 = arith.constant 0 : index
    %c0_34 = arith.constant 0 : index
    %c0_35 = arith.constant 0 : index
    %c0_36 = arith.constant 0 : index
    %42 = vector.load %arg5[%c0_32, %c0_33, %c0_34, %c0_35, %c0_36] : memref<1x1x3x8x128xf32, #tpu.memory_space<vmem>>, vector<1x1x1x2x128xf32>
    %43 = vector.shape_cast %42 : vector<1x1x1x2x128xf32> to vector<2x128xf32>
    %44 = arith.addf %43, %41 : vector<2x128xf32>
    %c0_37 = arith.constant 0 : index
    %c0_38 = arith.constant 0 : index
    %c0_39 = arith.constant 0 : index
    %c0_40 = arith.constant 0 : index
    %c0_41 = arith.constant 0 : index
    %45 = vector.load %arg5[%c0_37, %c0_38, %c0_39, %c0_40, %c0_41] : memref<1x1x3x8x128xf32, #tpu.memory_space<vmem>>, vector<1x1x1x2x128xf32>
    %46 = vector.shape_cast %45 : vector<1x1x1x2x128xf32> to vector<2x128xf32>
    %47 = vector.shape_cast %44 : vector<2x128xf32> to vector<1x1x1x2x128xf32>
    tpu.vector_store %arg5[%c0_37, %c0_38, %c0_39, %c0_40, %c0_41], %47 {strides = array<i32>} : memref<1x1x3x8x128xf32, #tpu.memory_space<vmem>>, vector<1x1x1x2x128xf32>,
    %c0_42 = arith.constant 0 : index
    %c0_43 = arith.constant 0 : index
    %c1_44 = arith.constant 1 : index
    %c0_45 = arith.constant 0 : index
    %c0_46 = arith.constant 0 : index
    %48 = vector.load %arg5[%c0_42, %c0_43, %c1_44, %c0_45, %c0_46] : memref<1x1x3x8x128xf32, #tpu.memory_space<vmem>>, vector<1x1x1x2x128xf32>
    %49 = vector.shape_cast %48 : vector<1x1x1x2x128xf32> to vector<2x128xf32>
    %50 = arith.addf %49, %40 : vector<2x128xf32>
    %c0_47 = arith.constant 0 : index
    %c0_48 = arith.constant 0 : index
    %c1_49 = arith.constant 1 : index
    %c0_50 = arith.constant 0 : index
    %c0_51 = arith.constant 0 : index
    %51 = vector.load %arg5[%c0_47, %c0_48, %c1_49, %c0_50, %c0_51] : memref<1x1x3x8x128xf32, #tpu.memory_space<vmem>>, vector<1x1x1x2x128xf32>
    %52 = vector.shape_cast %51 : vector<1x1x1x2x128xf32> to vector<2x128xf32>
    %53 = vector.shape_cast %50 : vector<2x128xf32> to vector<1x1x1x2x128xf32>
    tpu.vector_store %arg5[%c0_47, %c0_48, %c1_49, %c0_50, %c0_51], %53 {strides = array<i32>} : memref<1x1x3x8x128xf32, #tpu.memory_space<vmem>>, vector<1x1x1x2x128xf32>,
    %c0_52 = arith.constant 0 : index
    %c0_53 = arith.constant 0 : index
    %c2_54 = arith.constant 2 : index
    %c0_55 = arith.constant 0 : index
    %c0_56 = arith.constant 0 : index
    %54 = vector.load %arg5[%c0_52, %c0_53, %c2_54, %c0_55, %c0_56] : memref<1x1x3x8x128xf32, #tpu.memory_space<vmem>>, vector<1x1x1x2x128xf32>
    %55 = vector.shape_cast %54 : vector<1x1x1x2x128xf32> to vector<2x128xf32>
    %56 = arith.addf %55, %4 : vector<2x128xf32>
    %c0_57 = arith.constant 0 : index
    %c0_58 = arith.constant 0 : index
    %c2_59 = arith.constant 2 : index
    %c0_60 = arith.constant 0 : index
    %c0_61 = arith.constant 0 : index
    %57 = vector.load %arg5[%c0_57, %c0_58, %c2_59, %c0_60, %c0_61] : memref<1x1x3x8x128xf32, #tpu.memory_space<vmem>>, vector<1x1x1x2x128xf32>
    %58 = vector.shape_cast %57 : vector<1x1x1x2x128xf32> to vector<2x128xf32>
    %59 = vector.shape_cast %56 : vector<2x128xf32> to vector<1x1x1x2x128xf32>
    tpu.vector_store %arg5[%c0_57, %c0_58, %c2_59, %c0_60, %c0_61], %59 {strides = array<i32>} : memref<1x1x3x8x128xf32, #tpu.memory_space<vmem>>, vector<1x1x1x2x128xf32>,
    return
  }
  func.func @transform_0(%arg0: i32, %arg1: i32, %arg2: i32) -> (i32, i32, i32, i32) {
    %c1_i32 = arith.constant 1 : i32
    %0 = arith.muli %arg1, %c1_i32 : i32
    %1 = arith.addi %0, %arg2 : i32
    %c0_i32 = arith.constant 0 : i32
    %c0_i32_0 = arith.constant 0 : i32
    %c0_i32_1 = arith.constant 0 : i32
    return %arg0, %c0_i32, %1, %c0_i32_0 : i32, i32, i32, i32
  }
  func.func @transform_1(%arg0: i32, %arg1: i32, %arg2: i32) -> (i32, i32, i32) {
    %c1_i32 = arith.constant 1 : i32
    %0 = arith.muli %arg1, %c1_i32 : i32
    %1 = arith.addi %0, %arg2 : i32
    %c0_i32 = arith.constant 0 : i32
    %c0_i32_0 = arith.constant 0 : i32
    return %arg0, %1, %c0_i32 : i32, i32, i32
  }
  func.func @transform_2(%arg0: i32, %arg1: i32, %arg2: i32) -> (i32, i32, i32, i32, i32) {
    %c0_i32 = arith.constant 0 : i32
    %c0_i32_0 = arith.constant 0 : i32
    %c0_i32_1 = arith.constant 0 : i32
    %c0_i32_2 = arith.constant 0 : i32
    return %arg0, %arg1, %c0_i32, %c0_i32_0, %c0_i32_1 : i32, i32, i32, i32, i32
  }
}

</mosaic_0001>

<bundles_post_ra>
// kernel: tpu_custom_call.1
= control target key start
LH: loop header
LB: loop body
LE: loop exit
PB: predicated region body
PF: predicated region fallthrough
CT: control target
= control target key end

     0   :  { %7 = vsyncpa [#allocation3], 0  ;;  %s847_s0 = inlined_call_operand.hbm [shape: f32[2,4,2,128], index: 0, kind: input, shape index: {}]   ;;  %s848_s1 = inlined_call_operand.hbm [shape: f32[2,2,128], index: 1, kind: input, shape index: {}]   ;;  %s849_s2 = inlined_call_operand.hbm [shape: f32[2,1,3,8,128], index: 2, kind: output, shape index: {}]  }
   0x1   :  { %9 = vsyncpa [#allocation3 + $0x1], 0 }
   0x2   :  { %10 = vsyncpa [#allocation6], 0 }
   0x3   :  { %12 = vsyncpa [#allocation6 + $0x1], 0 }
   0x4   :  { %13 = vsyncpa [#allocation4], 0 }
   0x5   :  { %15 = vsyncpa [#allocation4 + $0x1], 0  ;;  %s696_s9 = smov 0   ;;  %s698_s10 = smov 0  }
   0x6   :  { %s700_s11 = smov 0   ;;  %s702_s12 = smov 0  }
   0x7   :  { %s704_s13 = smov 0   ;;  %s706_s14 = smov 0  }
   0x8 LB: > { %s421_s15 = sadd.s32 4294967295, %s674_s14   ;;  %s422_s16 = sadd.s32 4294967294, %s674_s14   ;;  %s674_s14 = sphi %s706_s14, %s21_s14   ;;  %s670_s13 = sphi %s704_s13, %s859_s13   ;;  %s666_s12 = sphi %s702_s12, %s858_s12   ;;  %s662_s11 = sphi %s700_s11, %s857_s11   ;;  %s658_s10 = sphi %s698_s10, %s856_s10   ;;  %s654_s9 = sphi %s696_s9, %s855_s9  }
   0x9   : > { %s40_s17 = sadd.s32 1, %s670_s13  ;;  %s51_s18 = sadd.s32 1, %s662_s11 }
   0xa   : > { %p42_p0 = scmp.ge.s32.totalorder %s40_s17, 2  ;;  %p58_p1 = scmp.ne.s32.totalorder %s662_s11, %s658_s10 }
   0xb   : > { %p59_p2 = scmp.eq.s32.totalorder %s674_s14, 0  ;;  %p64_p3 = scmp.ne.s32.totalorder %s658_s10, %s654_s9 }
   0xc   : > { %s861_s17 = smov (%p42_p0, %s40_s17), 0  ;;  %p65_p5 = scmp.eq.s32.totalorder %s421_s15, 0 }
   0xd   : > { %p737_p4 = por %p59_p2, %p58_p1  ;;  %s46_s20 = ssub.s32 %s670_s13, %s861_s17 }
   0xe   : > { %p120_p6 = scmp.eq.s32.totalorder %s421_s15, 1  ;;  %p49_p7 = scmp.eq.s32.totalorder %s46_s20, 0 }
   0xf   : > { %p743_p8 = por %p65_p5, %p64_p3  ;;  %p126_p10 = scmp.eq.s32.totalorder %s422_s16, 1 }
  0x10   : > { %p747_p9 = por %p120_p6, %p58_p1  ;;  %p424_p12 = scmp.ge.s32.totalorder %s674_s14, 2 }
  0x11   : > { %s752_s23 = scalar_select %p49_p7, %s662_s11, %s51_s18  }
  0x12   : > { %p754_p11 = por %p126_p10, %p64_p3  ;;  %p463_p13 = scmp.lt.s32.totalorder %s674_s14, 2 }
  0x13   : > { %s146_s25 = sand.u32 1, %s662_s11   ;;  %s443_s27 = sshll.u32 %s670_s13, 3 }
  0x14   : > { %s425_s26 = sshll.u32 %s146_s25, 3  ;;  %s157_s30 = scalar_lea.hbm %s847_s0, %s443_s27 }
  0x15   : > { %s150_s3 = scalar_lea.vmem [#allocation2], %s425_s26  ;;  %s158_s5 = sshll.u32 %s157_s30, 4  ;;  %s159_s5 = int_to_ptr.hbm [resolvable:$true] %s158_s5 }
  0x16   : > { %s160_s4 = sshll.u32 %s150_s3, 4  ;;  %p767_p0 = pnand %p463_p13, %p737_p4  ;;  %s161_s4 = int_to_ptr.vmem [resolvable:$true] %s160_s4 }
  0x17   : > { %p430_p1 = scmp.ge.s32.totalorder %s674_s14, 1  ;;  %s147_s7 = scalar_lea.sflag [#allocation3], %s146_s25 }
  0x18   : > { %s676_s8 = smov 32   ;;  %s677_s15 = smov 2  }
  0x19   : > { %455 = dma.hbm_to_vmem [thread:$0]  (!%p767_p0), %s159_s5, 128, %s161_s4, %s147_s7, %s676_s8, %s676_s8, %s677_s15  }
  0x1a   : > { %p189_p2 = scmp.lt.s32.totalorder %s674_s14, 3  ;;  %s428_s16 = sshll.u32 %s146_s25, 1 }
  0x1b   : > { %s429_s18 = sshll.u32 %s670_s13, 1  ;;  %s174_s27 = scalar_lea.vmem [#allocation5], %s428_s16 }
  0x1c   : > { %p190_p3 = pnand %p430_p1, %p189_p2  ;;  %s180_s19 = scalar_lea.hbm %s848_s1, %s429_s18 }
  0x1d   : > { %s184_s28 = sshll.u32 %s174_s27, 4  ;;  %s182_s29 = sshll.u32 %s180_s19, 4  ;;  %s185_s28 = int_to_ptr.vmem [resolvable:$true] %s184_s28  ;;  %s183_s29 = int_to_ptr.hbm [resolvable:$true] %s182_s29 }
  0x1e   : > { %s171_s30 = scalar_lea.sflag [#allocation6], %s146_s25  ;;  %193 = sbr.rel (%p190_p3) target bundleno = 88 (0x58), region = 28 }
  0x1f   : > { %458 = dma.hbm_to_vmem [thread:$0]  (!%p767_p0), %s183_s29, 32, %s185_s28, %s171_s30  }
  0x20   : > { %s782_s3 = sand.u32 (!%p190_p3), 1, %s658_s10  }
  0x21   : > { %s431_s4 = sshll.u32 (!%p190_p3), %s782_s3, 3  ;;  %s196_s5 = scalar_lea.sflag (!%p190_p3), [#allocation3], %s782_s3 }
  0x22   : > { %s199_s7 = scalar_lea.vmem (!%p190_p3), [#allocation2], %s431_s4 }
  0x23   : > { %641 = dma.done.wait (%p743_p8), %s196_s5, 128  }
  0x24   : > { %643 = vsyncadd (%p743_p8), %s196_s5, 4294967168  ;;  %s432_s25 = sshll.u32 %s782_s3, 1  ;;  %s206_s6 = scalar_lea.sflag [#allocation6], %s782_s3 }
  0x25   : > { %s209_s8 = scalar_lea.vmem [#allocation5], %s432_s25 }
  0x26   : > { %645 = dma.done.wait (%p743_p8), %s206_s6, 32  }
  0x27   : > { %647 = vsyncadd (%p743_p8), %s206_s6, 4294967264  ;;  %s444_s15 = smul.u32 24, %s782_s3  ;;  %v678_v0 = vmov 0.0   ;;  %v246_v1 = vld [vmem:[%s199_s7] sm:$0x3]  ;;  %s608_s5 = scalar_lea.hbm %s849_s2, 48 }
  0x28   : > { %v433_v2 = vld [vmem:[%s199_s7 + $0x2] sm:$0x3]  ;;  %v434_v4 = vld [vmem:[%s199_s7 + $0x4] sm:$0x3]  ;;  %v435_v5 = vld [vmem:[%s199_s7 + $0x6] sm:$0x3] }
  0x29   : > { %s797_s16 = scalar_lea.vmem [#allocation7], %s444_s15  ;;  %v249_v3 = vmax.f32 %v246_v1, %v433_v2  ;;  %v245_v15 = vld [vmem:[%s209_s8] sm:$0x3]  ;;  %s445_s21 = smul.u32 24, %s666_s12 }
  0x2a   : > { %242 = vst [vmem:[%s797_s16] sm:$0xff] %v678_v0  ;;  %s303_s19 = sshll.u32 %s797_s16, 4  ;;  %s289_s12 = scalar_lea.sflag [#allocation4], %s782_s3  ;;  %s304_s19 = int_to_ptr.vmem [resolvable:$true] %s303_s19 }
  0x2b   : > { %243 = vst [vmem:[%s797_s16 + $0x8] sm:$0xff] %v678_v0  ;;  %v252_v6 = vmax.f32 %v249_v3, %v434_v4  ;;  %s302_s26 = scalar_lea.hbm %s849_s2, %s445_s21 }
  0x2c   : > { %244 = vst [vmem:[%s797_s16 + $0x10] sm:$0xff] %v678_v0  ;;  %s305_s27 = sshll.u32 %s302_s26, 4  ;;  %s306_s27 = int_to_ptr.hbm [resolvable:$true] %s305_s27 }
  0x2d   : > { %v255_v7 = vmax.f32 %v252_v6, %v435_v5  ;;  %s602_s28 = sshra.s32 %s306_s27, 4  ;;  %s603_s28 = int_to_ptr.hbm [resolvable:$true] %s602_s28 }
  0x2e   : > { %s604_s29 = scalar_lea.hbm %s603_s28, 24  ;;  %p609_p7 = scmp.lt.s32.totalorder %s603_s28, %s849_s2 }
  0x2f   : > { %v256_v8 = vsub.f32 %v246_v1, %v255_v7  ;;  %v259_v9 = vsub.f32 %v433_v2, %v255_v7  ;;  %v263_v10 = vsub.f32 %v434_v4, %v255_v7  ;;  %v267_v11 = vsub.f32 %v435_v5, %v255_v7  ;;  %p605_p4 = scmp.ne.s32.totalorder %s603_s28, %s604_s29  ;;  %p610_p8 = scmp.lt.s32.totalorder %s608_s5, %s604_s29 }
  0x31   : > { %v257_v12 = vmul.f32 1.442695, %v256_v8  ;;  %v260_v13 = vmul.f32 1.442695, %v259_v9  ;;  %v264_v14 = vmul.f32 1.442695, %v263_v10  ;;  %p606_p5 = pnand %p605_p4, %p747_p9  ;;  %p611_p10 = por %p610_p8, %p609_p7 }
  0x32   : > { %v268_v16 = vmul.f32 1.442695, %v267_v11  ;;  %v436_v30 = vld [vmem:[%s797_s16 + $0x8] sm:$0x3]  ;;  %v277_v32 = vld [vmem:[%s797_s16] sm:$0x3] }
  0x33   : > { %v438_v17 = vld [vmem:[%s797_s16 + $0x10] sm:$0x3]  ;;  %518 = vpow2.f32 %v257_v12  ;;  %p607_p6 = pneg %p606_p5 }
  0x34   : > { %v286_v18 = vadd.f32 %v438_v17, %v245_v15  ;;  %520 = vpow2.f32 %v260_v13 }
  0x35   : > { %522 = vpow2.f32 %v264_v14  ;;  %p612_p13 = pnand %p611_p10, %p607_p6 }
  0x36   : > { %439 = vst [vmem:[%s797_s16 + $0x10] sm:$0x3] %v286_v18  ;;  %524 = vpow2.f32 %v268_v16 }
  0x39   : > { %v519_v19 = vpop.eup %518 }
  0x3a   : > { %v521_v20 = vpop.eup %520 }
  0x3b   : > { %v523_v21 = vpop.eup %522  ;;  %v262_v22 = vadd.f32 %v521_v20, %v519_v19 }
  0x3c   : > { %v525_v23 = vpop.eup %524 }
  0x3d   : > { %v266_v24 = vadd.f32 %v523_v21, %v262_v22 }
  0x3f   : > { %v270_v25 = vadd.f32 %v525_v23, %v266_v24 }
  0x41   : > { %526 = vrcp.f32 %v270_v25 }
  0x47   : > { %v527_v26 = vpop.eup %526 }
  0x48   : > { %v272_v27 = vmul.f32 %v527_v26, %v270_v25 }
  0x4a   : > { %v273_v28 = vsub.f32 2.0, %v272_v27 }
  0x4c   : > { %v274_v29 = vmul.f32 %v527_v26, %v273_v28 }
  0x4e   : > { %v275_v31 = vmul.f32 %v521_v20, %v274_v29 }
  0x50   : > { %v276_v33 = vmul.f32 %v275_v31, %v245_v15  ;;  %v282_v34 = vadd.f32 %v436_v30, %v275_v31 }
  0x52   : > { %v278_v35 = vadd.f32 %v277_v32, %v276_v33  ;;  %437 = vst [vmem:[%s797_s16 + $0x8] sm:$0x3] %v282_v34 }
  0x54   : > { %279 = vst [vmem:[%s797_s16] sm:$0x3] %v278_v35 }
  0x55   : > { %615 = shalt.err (!%p612_p13)
}
  0x56   : > { %s679_s3 = smov 128   ;;  %s680_s6 = smov 8  }
  0x57   : > { %450 = dma.vmem_to_hbm [thread:$0]  (%p747_p9), %s304_s19, 384, %s306_s27, %s289_s12, %s679_s3, %s679_s3, %s680_s6  }
  0x58 PF: > { %s320_s8 = sand.u32 1, %s654_s9   ;;  %p460_p0 = pnand %p424_p12, %p754_p11 }
  0x59   : > { %s321_s15 = scalar_lea.sflag [#allocation4], %s320_s8 }
  0x5a   : > { %p461_p1 = pneg %p460_p0 }
  0x5c   : > { %649 = dma.done.wait (%p461_p1), %s321_s15, 384  }
  0x5d   : > { %651 = vsyncadd (%p461_p1), %s321_s15, 4294966912  ;;  %s21_s14 = sadd.s32 1, %s674_s14   ;;  %s855_s9 = smov %s658_s10 }
  0x5e   : > { %p18_p2 = scmp.ge.s32.totalorder %s21_s14, 4   ;;  %s856_s10 = smov %s662_s11 }
  0x5f   : > { %s857_s11 = smov %s752_s23  ;;  %s858_s12 = smov %s670_s13 }
  0x60   : > { %s859_s13 = smov %s861_s17  ;;  %20 = sbr.rel (!%p18_p2) target bundleno = 8 (0x8), region = 95 }
  0x65   :  { %327 = vsyncpa [#allocation3], 1 }
  0x66   :  { %329 = vsyncpa [#allocation3 + $0x1], 1 }
  0x67   :  { %330 = vsyncpa [#allocation6], 1 }
  0x68   :  { %332 = vsyncpa [#allocation6 + $0x1], 1 }
  0x69   :  { %333 = vsyncpa [#allocation4], 1 }
  0x6a   :  { %335 = vsyncpa [#allocation4 + $0x1], 1 }

</bundles_post_ra>
